<compile_context>
chip_gen: v7x
topology: tpu7x:2x2x1
jax: 0.10.0
libtpu: 0.0.40
codegen_flags: <defaults>
</compile_context>

<pallas_src>
import math

import jax
import jax.numpy as jnp
from jax.experimental import pallas as pl
from jax.experimental.pallas import tpu as pltpu


def _round_up(x, m):
    return ((x + m - 1) // m) * m


def _packed_lin_relu_kernel(x_ref, w_ref, b_ref, o_ref):
    """One M-tile of y = relu(x @ Wbd + b) in the row-packed layout.

    x_ref: (TR, P*Cin)     packed input rows (P original rows per sublane row)
    w_ref: (P*Cin, P*Cout) block-diagonal weight, grid-invariant (VMEM resident)
    b_ref: (1, P*Cout)     bias tiled P times
    o_ref: (TR, P*Cout)    packed output, lane-dense (P*Cout multiple of 128)
    """
    y = jnp.dot(x_ref[...], w_ref[...], preferred_element_type=jnp.float32)
    y = y + b_ref[...].astype(jnp.float32)
    o_ref[...] = jnp.maximum(y, 0.0).astype(o_ref.dtype)


def mqa_feat_transition_forward(x, weight, bias, *, block_rows=8192, out_dtype=None):
    """x: (..., Cin); weight: (Cout, Cin) [PyTorch layout]; bias: (Cout,)."""
    orig_shape = x.shape
    cin = orig_shape[-1]
    cout = weight.shape[0]
    assert weight.shape[1] == cin and bias.shape == (cout,)
    out_dtype = x.dtype if out_dtype is None else out_dtype

    x2d = x.reshape(-1, cin)
    m = x2d.shape[0]

    # Pack P rows per lane-row so the packed output width P*Cout is a multiple
    # of 128 lanes (fully lane-dense stores / writeback DMAs).  Keep P=8.
    p = max(1, 128 // math.gcd(128, cout))

    # Pad only up to a multiple of P (at most P-1 rows; usually a no-op), NOT up
    # to a multiple of the tile — the ragged last block is handled by Pallas.
    m_pad = _round_up(m, p)
    if m_pad != m:
        x2d = jnp.pad(x2d, ((0, m_pad - m), (0, 0)))
    mp = m_pad // p
    xp = x2d.reshape(mp, p * cin)                    # free row-major reshape

    # Packed-row tiling: TR packed rows per grid step (multiple of 8).
    tr = max(8, min(_round_up(block_rows, 8), _round_up(mp, 8)))
    grid = (pl.cdiv(mp, tr),)

    # Block-diagonal packed weight and tiled bias (built once, tiny).
    w_t = weight.T.astype(x.dtype)                   # (Cin, Cout)
    wbd = jnp.kron(jnp.eye(p, dtype=x.dtype), w_t)   # (P*Cin, P*Cout)
    bp = jnp.tile(bias.astype(x.dtype), p).reshape(1, p * cout)

    # VMEM budget: input tile is lane-padded 24 -> 128 lanes in VMEM.
    bytes_per_step = tr * 128 * 4 + tr * p * cout * jnp.dtype(out_dtype).itemsize
    vmem_limit = int(min(48 << 20, max(32 << 20, 2 * bytes_per_step + (2 << 20))))

    itemsize_in = jnp.dtype(x.dtype).itemsize
    cost = pl.CostEstimate(
        flops=2 * mp * (p * cin) * (p * cout),
        transcendentals=0,
        bytes_accessed=int(
            m_pad * cin * itemsize_in
            + m_pad * cout * jnp.dtype(out_dtype).itemsize
            + wbd.size * itemsize_in
        ),
    )

    outp = pl.pallas_call(
        _packed_lin_relu_kernel,
        out_shape=jax.ShapeDtypeStruct((mp, p * cout), out_dtype),
        grid=grid,
        in_specs=[
            pl.BlockSpec((tr, p * cin), lambda i: (i, 0)),
            pl.BlockSpec((p * cin, p * cout), lambda i: (0, 0)),
            pl.BlockSpec((1, p * cout), lambda i: (0, 0)),
        ],
        out_specs=pl.BlockSpec((tr, p * cout), lambda i: (i, 0)),
        compiler_params=pltpu.CompilerParams(
            dimension_semantics=("parallel",),
            vmem_limit_bytes=vmem_limit,
        ),
        cost_estimate=cost,
    )(xp, wbd, bp)

    out2d = outp.reshape(m_pad, cout)                # free row-major reshape
    if m_pad != m:
        out2d = out2d[:m]                            # drop the <=P-1 padded rows
    return out2d.reshape(*orig_shape[:-1], cout)


def init_params(key, in_features=3, out_features=16, dtype=jnp.float32):
    # Deterministic init mimicking torch.nn.Linear defaults.
    kw, kb = jax.random.split(key)
    bound = 1.0 / (in_features ** 0.5)
    weight = jax.random.uniform(
        kw, (out_features, in_features), dtype, minval=-bound, maxval=bound
    )
    bias = jax.random.uniform(
        kb, (out_features,), dtype, minval=-bound, maxval=bound
    )
    return weight, bias


if __name__ == "__main__":
    key = jax.random.PRNGKey(0)
    k_x, k_p, k_x2 = jax.random.split(key, 3)

    in_features, out_features = 3, 16
    batch, seq = 2, 8
    x = jax.random.normal(k_x, (batch, seq, in_features), jnp.float32)
    weight, bias = init_params(k_p, in_features, out_features)

    out = mqa_feat_transition_forward(x, weight, bias)
    out = jax.block_until_ready(out)

    # Pure-JAX reference (HIGHEST precision; tolerance covers MXU rounding).
    ref = jnp.maximum(
        jnp.einsum("bsc,oc->bso", x, weight,
                   precision=jax.lax.Precision.HIGHEST) + bias, 0.0)
    assert out.shape == (batch, seq, out_features)
    assert jnp.allclose(out, ref, atol=2e-2, rtol=2e-2)

    # Second check: exercises multi-tile grid, ragged last block and the
    # pad-to-multiple-of-P tail path (3*700 = 2100 rows, not a multiple of 8).
    x2 = jax.random.normal(k_x2, (3, 700, in_features), jnp.float32)
    out2 = mqa_feat_transition_forward(x2, weight, bias, block_rows=64)
    out2 = jax.block_until_ready(out2)
    ref2 = jnp.maximum(
        jnp.einsum("bsc,oc->bso", x2, weight,
                   precision=jax.lax.Precision.HIGHEST) + bias, 0.0)
    assert out2.shape == (3, 700, out_features)
    assert jnp.allclose(out2, ref2, atol=2e-2, rtol=2e-2)

    print("KERNEL_OK")
</pallas_src>

<mosaic_0001>
module attributes {stable_mosaic.version = 11 : i64} {
  func.func @_packed_lin_relu_kernel(%arg0: i32, %arg1: memref<8x24xf32, #tpu.memory_space<vmem>>, %arg2: memref<24x128xf32, #tpu.memory_space<vmem>>, %arg3: memref<1x128xf32, #tpu.memory_space<vmem>>, %arg4: memref<8x128xf32, #tpu.memory_space<vmem>>) attributes {dimension_semantics = [#tpu.dimension_semantics<parallel>], iteration_bounds = array<i64: 1>, scalar_prefetch = 0 : i64, scratch_operands = 0 : i64, tpu.core_type = #tpu.core_type<tc>, window_params = [{transform_indices = @transform_0, window_bounds = array<i64: 8, 24>}, {pipeline_mode = #tpu.pipeline_mode<synchronous>, transform_indices = @transform_1, window_bounds = array<i64: 24, 128>}, {pipeline_mode = #tpu.pipeline_mode<synchronous>, transform_indices = @transform_2, window_bounds = array<i64: 1, 128>}, {transform_indices = @transform_3, window_bounds = array<i64: 8, 128>}]} {
    %c0 = arith.constant 0 : index
    %c0_0 = arith.constant 0 : index
    %0 = vector.load %arg1[%c0, %c0_0] : memref<8x24xf32, #tpu.memory_space<vmem>>, vector<8x24xf32>
    %c0_1 = arith.constant 0 : index
    %c0_2 = arith.constant 0 : index
    %1 = vector.load %arg2[%c0_1, %c0_2] : memref<24x128xf32, #tpu.memory_space<vmem>>, vector<24x128xf32>
    %cst = arith.constant dense<0.000000e+00> : vector<8x128xf32>
    %2 = tpu.matmul %0, %1, %cst {dimension_numbers = #tpu.dot_dimension_numbers<[1], [0], [0], [1], [0, 0, 1, 1], [], []>} : vector<8x24xf32>, vector<24x128xf32>, vector<8x128xf32> -> vector<8x128xf32>
    %c0_3 = arith.constant 0 : index
    %c0_4 = arith.constant 0 : index
    %3 = vector.load %arg3[%c0_3, %c0_4] : memref<1x128xf32, #tpu.memory_space<vmem>>, vector<1x128xf32>
    %4 = vector.broadcast %3 : vector<1x128xf32> to vector<8x128xf32>
    %5 = arith.addf %2, %4 : vector<8x128xf32>
    %cst_5 = arith.constant 0.000000e+00 : f32
    %6 = vector.broadcast %cst_5 : f32 to vector<8x128xf32>
    %7 = arith.maximumf %5, %6 : vector<8x128xf32>
    %c0_6 = arith.constant 0 : index
    %c0_7 = arith.constant 0 : index
    %8 = vector.load %arg4[%c0_6, %c0_7] : memref<8x128xf32, #tpu.memory_space<vmem>>, vector<8x128xf32>
    tpu.vector_store %arg4[%c0_6, %c0_7], %7 {strides = array<i32>} : memref<8x128xf32, #tpu.memory_space<vmem>>, vector<8x128xf32>,
    return
  }
  func.func @transform_0(%arg0: i32) -> (i32, i32) {
    %c0_i32 = arith.constant 0 : i32
    %c0_i32_0 = arith.constant 0 : i32
    return %arg0, %c0_i32 : i32, i32
  }
  func.func @transform_1(%arg0: i32) -> (i32, i32) {
    %c0_i32 = arith.constant 0 : i32
    %c0_i32_0 = arith.constant 0 : i32
    %c0_i32_1 = arith.constant 0 : i32
    return %c0_i32, %c0_i32_0 : i32, i32
  }
  func.func @transform_2(%arg0: i32) -> (i32, i32) {
    %c0_i32 = arith.constant 0 : i32
    %c0_i32_0 = arith.constant 0 : i32
    %c0_i32_1 = arith.constant 0 : i32
    return %c0_i32, %c0_i32_0 : i32, i32
  }
  func.func @transform_3(%arg0: i32) -> (i32, i32) {
    %c0_i32 = arith.constant 0 : i32
    %c0_i32_0 = arith.constant 0 : i32
    return %arg0, %c0_i32 : i32, i32
  }
}

</mosaic_0001>

<bundles_post_ra>
// kernel: tpu_custom_call.1
= control target key start
LH: loop header
LB: loop body
LE: loop exit
PB: predicated region body
PF: predicated region fallthrough
CT: control target
= control target key end

     0   :  { %8 = vsyncpa [#allocation3], 0  ;;  %s323_s0 = inlined_call_operand.hbm [shape: f32[2,24], index: 0, kind: input, shape index: {}]   ;;  %s324_s1 = inlined_call_operand.hbm [shape: f32[24,128], index: 1, kind: input, shape index: {}]   ;;  %s325_s2 = inlined_call_operand.vmem [shape: f32[1,128], index: 2, kind: input, shape index: {}]   ;;  %s326_s3 = inlined_call_operand.hbm [shape: f32[2,128], index: 3, kind: output, shape index: {}]  }
   0x1   :  { %9 = vsyncpa [#allocation6], 0 }
   0x2   :  { %10 = vsyncpa [#allocation4], 0 }
   0x3   :  { %15 = vsyncadd [#allocation3], 96  ;;  %s248_s12 = smov [#allocation2]   ;;  %s176_s16 = scalar_lea.hbm %s323_s0, 32 }
   0x4   :  { %s16_s13 = sshll.u32 %s248_s12, 4  ;;  %p177_p0 = scmp.ne.s32.totalorder %s323_s0, %s176_s16  ;;  %s17_s13 = int_to_ptr.vmem [resolvable:$true] %s16_s13 }
   0x5   :  { %p180_p1 = scmp.lt.u32.totalorder %s176_s16, %s323_s0 }
   0x7   :  { %p182_p2 = pnand %p180_p1, %p177_p0 }
   0x9   :  { %185 = shalt.err (!%p182_p2)
}
   0xa   :  { %s186_s21 = scalar_lea.vmem %s17_s13, 32  ;;  %s190_s22 = scalar_lea.vmem %s17_s13, 128 }
   0xb   :  { %p187_p3 = scmp.ne.s32.totalorder %s17_s13, %s186_s21  ;;  %p191_p4 = scmp.lt.s32.totalorder %s17_s13, %s17_s13 }
   0xc   :  { %p192_p5 = scmp.lt.s32.totalorder %s190_s22, %s186_s21 }
   0xe   :  { %p193_p6 = por %p192_p5, %p191_p4 }
  0x10   :  { %p194_p7 = pnand %p193_p6, %p187_p3 }
  0x12   :  { %197 = shalt.err (!%p194_p7)
}
  0x13   :  { %s249_s23 = smov 32   ;;  %s250_s24 = smov 2  }
  0x14   :  { %22 = dma.hbm_to_vmem [thread:$0]  %s323_s0, 32, %s17_s13, [#allocation3], %s249_s23, %s249_s23, %s250_s24  }
  0x15   :  { %s251_s27 = smov [#allocation5]   ;;  %s198_s4 = scalar_lea.hbm %s324_s1, 384 }
  0x16   :  { %s28_s28 = sshll.u32 %s251_s27, 4  ;;  %p199_p8 = scmp.ne.s32.totalorder %s324_s1, %s198_s4  ;;  %s29_s28 = int_to_ptr.vmem [resolvable:$true] %s28_s28 }
  0x17   :  { %p202_p9 = scmp.lt.u32.totalorder %s198_s4, %s324_s1 }
  0x19   :  { %p204_p10 = pnand %p202_p9, %p199_p8 }
  0x1b   :  { %207 = shalt.err (!%p204_p10)
}
  0x1c   :  { %s208_s9 = scalar_lea.vmem %s29_s28, 384  ;;  %p213_p12 = scmp.lt.s32.totalorder %s29_s28, %s29_s28 }
  0x1d   :  { %p209_p11 = scmp.ne.s32.totalorder %s29_s28, %s208_s9  ;;  %p214_p13 = scmp.lt.s32.totalorder %s208_s9, %s208_s9 }
  0x1f   :  { %p215_p0 = por %p214_p13, %p213_p12 }
  0x21   :  { %p216_p1 = pnand %p215_p0, %p209_p11 }
  0x23   :  { %219 = shalt.err (!%p216_p1)
}
  0x24   :  { %s252_s0 = smov 128   ;;  %s253_s10 = smov 8  }
  0x25   :  { %34 = dma.hbm_to_vmem [thread:$0]  %s324_s1, 384, %s29_s28, [#allocation6], %s252_s0, %s252_s0, %s253_s10  }
  0x26   :  { %242 = dma.done.wait [#allocation3], 128  }
  0x27   :  { %243 = vsyncadd [#allocation3], 4294967168 }
  0x28   :  { %244 = dma.done.wait [#allocation6], 384  }
  0x29   :  { %245 = vsyncadd [#allocation6], 4294966912  ;;  %v254_v0 = vmov 0.0|0.0   ;;  %vm255_vm0 = vmmov 0   ;;  %v256_v1 = vmov 0.0   ;;  %v44_v2 = vld [vmem:[#allocation5] sm:$0xff] }
  0x2a   :  { %163 = vmatprep.subr.bf16.mxu0 %v254_v0  ;;  %160 = vmatprep.mubr.msk.f32.mxu0 %vm255_vm0, %v256_v1  ;;  %v45_v3 = vld [vmem:[#allocation5 + $0x8] sm:$0xff]  ;;  %v46_v5 = vld [vmem:[#allocation5 + $0x10] sm:$0xff]  ;;  %v43_v6 = vld [vmem:[#allocation2] sm:$0xff]  ;;  %vm54_vm1 = vcmask 195584  }
  0x2b   :  { %v164_v4 = vpack.c.bf16 %v45_v3, %v44_v2  ;;  %v148_v7 = vld [vmem:[%s325_s2] ss:$0 sm:$0xff] }
  0x2d   :  { %165 = vmatpush3.bf16.msra.mxu0 %v164_v4 }
  0x2e   :  { %158 = vmatprep.subr.mxu0 %v256_v1 }
  0x31   :  { %159 = vmatpush3.msra.mxu0 %v46_v5 }
  0x32   :  { %161 = vmatmul.mubr.msk.f32.vlgmr.msra.gmra.mrb[0].mxu0 %vm54_vm1, %v43_v6 }
 0x105   :  { %v124_v8 = vpop.f32.mrb[0].mxu0 }
 0x106   :  { %v125_v9 = vadd.f32 %v148_v7, %v124_v8  ;;  %v162_v10 = vpop.f32.mrb[1].mxu0 }
 0x108   :  { %v128_v11 = vmax.f32 %v125_v9, 0.0 }
 0x10a   :  { %129 = vst [vmem:[#allocation7] sm:$0xff] %v128_v11 }
 0x10b   :  { %134 = vsyncadd [#allocation4], 96  ;;  %s257_s14 = smov [#allocation7]  }
 0x10c   :  { %s135_s15 = sshll.u32 %s257_s14, 4  ;;  %s136_s15 = int_to_ptr.vmem [resolvable:$true] %s135_s15 }
 0x10d   :  { %s220_s16 = scalar_lea.vmem %s136_s15, 32  ;;  %s224_s17 = scalar_lea.vmem %s136_s15, 128 }
 0x10e   :  { %p221_p2 = scmp.ne.s32.totalorder %s136_s15, %s220_s16  ;;  %p225_p3 = scmp.lt.s32.totalorder %s136_s15, %s136_s15 }
 0x10f   :  { %p226_p4 = scmp.lt.s32.totalorder %s224_s17, %s220_s16 }
 0x111   :  { %p227_p5 = por %p226_p4, %p225_p3 }
 0x113   :  { %p228_p6 = pnand %p227_p5, %p221_p2 }
 0x115   :  { %231 = shalt.err (!%p228_p6)
}
 0x116   :  { %s232_s2 = scalar_lea.hbm %s326_s3, 32 }
 0x117   :  { %p233_p7 = scmp.ne.s32.totalorder %s326_s3, %s232_s2  ;;  %p236_p8 = scmp.lt.u32.totalorder %s232_s2, %s326_s3 }
 0x119   :  { %p238_p9 = pnand %p236_p8, %p233_p7 }
 0x11b   :  { %241 = shalt.err (!%p238_p9)
}
 0x11c   :  { %141 = dma.vmem_to_hbm [thread:$0]  %s136_s15, 32, %s326_s3, [#allocation4], %s249_s23, %s249_s23, %s250_s24  }
 0x11d   :  { %246 = dma.done.wait [#allocation4], 128  }
 0x11e   :  { %247 = vsyncadd [#allocation4], 4294967168 }
 0x11f   :  { %145 = vsyncpa [#allocation3], 1 }
 0x120   :  { %146 = vsyncpa [#allocation6], 1 }
 0x121   :  { %147 = vsyncpa [#allocation4], 1 }

</bundles_post_ra>
